<compile_context>
chip_gen: v5e
topology: v5e:2x2
jax: 0.10.0
libtpu: 0.0.40
codegen_flags: <defaults>
</compile_context>

<pallas_src>
import functools

import jax
import jax.numpy as jnp
from jax.experimental import pallas as pl
from jax.experimental.pallas import tpu as pltpu


def simple_gate_kernel(a_ref, b_ref, o_ref, *, approximate):
    # a_ref: (rt, lanes) "gelu" half, b_ref: (rt, lanes) "gate" half.
    a = a_ref[...].astype(jnp.float32)
    b = b_ref[...].astype(jnp.float32)
    g = jax.nn.gelu(a, approximate=approximate)  # tanh -> EUP slot (default)
    o_ref[...] = (g * b).astype(o_ref.dtype)


def _largest_divisor_multiple_of(dim, base, cap):
    """Largest multiple of `base` that divides `dim` and is <= max(cap, base).

    Precondition: dim % base == 0.
    """
    t = min(max(cap, base), dim)
    t -= t % base
    while t > base and dim % t != 0:
        t -= base
    return t


def _choose_tiling(m, itemsize, sub_base, target_tile_bytes, n_batch):
    """Pick (m_pad, rows, lanes, row_tile) for a flat half of `m` elements.

    rows * lanes == m_pad, lanes % 128 == 0, row_tile divides rows, and one
    (row_tile, lanes) tile is <= target_tile_bytes.
    """
    # Lane width capped so even a minimum-height (sub_base rows) tile fits the
    # byte budget.
    lane_cap = max(128, (target_tile_bytes // (sub_base * itemsize)) // 128 * 128)

    lanes = None
    m_pad = m
    if m % 128 == 0:
        best_any = None
        d = min(lane_cap, m) // 128 * 128
        while d >= 128:
            if m % d == 0:
                if best_any is None:
                    best_any = d
                if (m // d) % sub_base == 0:  # sublane-clean row count
                    lanes = d
                    break
            d -= 128
        if lanes is None and best_any is not None:
            # No sublane-clean divisor: only usable if the whole half fits one
            # budget-sized full-extent tile; otherwise pad below.
            if m * itemsize <= target_tile_bytes:
                lanes = best_any

    if lanes is None:
        # Pad (wrapper-side) to a clean (sub_base, 128) grid rather than
        # emitting masked partial stores or an oversized full-extent tile.
        lanes = 128
        m_pad = -(-m // (sub_base * 128)) * (sub_base * 128)

    rows = m_pad // lanes

    # Row tile: dtype-aligned, within the byte budget, and small enough that
    # the total grid has >= ~8 steps when possible (keeps both v7x TCs busy).
    row_cap = max(sub_base, target_tile_bytes // (lanes * itemsize))
    needed_row_steps = -(-8 // max(1, n_batch))
    row_cap = min(row_cap, max(sub_base, rows // needed_row_steps))
    if rows % sub_base == 0:
        rt = _largest_divisor_multiple_of(rows, sub_base, row_cap)
    else:
        rt = rows  # tiny array: full-extent rows block (always legal)
    return m_pad, rows, lanes, rt


def simple_gate(x, *, exact_gelu=False, target_tile_bytes=4 * 1024 * 1024):
    """x: (N, C, H, W), C even. Returns gelu(x[:, :C//2]) * x[:, C//2:]."""
    n, c, h, w = x.shape
    assert c % 2 == 0, "SimpleGate requires an even number of channels"
    c_half = c // 2
    m = c_half * h * w

    itemsize = jnp.dtype(x.dtype).itemsize
    sub_base = {4: 8, 2: 16, 1: 32}.get(itemsize, 8)

    m_pad, rows, lanes, rt = _choose_tiling(
        m, itemsize, sub_base, target_tile_bytes, n)

    # Free reshape: (N, 2, C/2*H*W); each half is one contiguous slab.
    x3 = x.reshape(n, 2, m)
    if m_pad != m:
        # Rare fallback (flat half size not a multiple of 128): pad + slice.
        x3 = jnp.pad(x3, ((0, 0), (0, 0), (0, m_pad - m)))
    x4 = x3.reshape(n, 2, rows, lanes)

    grid = (n, rows // rt)

    # Same array passed twice; the half axis (size 2) is indexed 0 / 1 and
    # squeezed (None) out of the kernel view, as is the batch axis.
    a_spec = pl.BlockSpec((None, None, rt, lanes), lambda i, j: (i, 0, j, 0))
    b_spec = pl.BlockSpec((None, None, rt, lanes), lambda i, j: (i, 1, j, 0))
    o_spec = pl.BlockSpec((None, rt, lanes), lambda i, j: (i, j, 0))

    kernel = functools.partial(simple_gate_kernel, approximate=not exact_gelu)

    out = pl.pallas_call(
        kernel,
        out_shape=jax.ShapeDtypeStruct((n, rows, lanes), x.dtype),
        grid=grid,
        in_specs=[a_spec, b_spec],
        out_specs=o_spec,
        compiler_params=pltpu.CompilerParams(
            dimension_semantics=("parallel", "parallel"),
            # Explicit scoped-VMEM limit: fits 3 refs x 2 buffers x 4 MiB
            # tiles (+ internal scratch) on v5e's 16 MiB default and stays
            # under v7x's 64 MiB physical VMEM.
            vmem_limit_bytes=48 * 1024 * 1024),
    )(x4, x4)

    out = out.reshape(n, m_pad)
    if m_pad != m:
        out = out[:, :m]
    return out.reshape(n, c_half, h, w)


if __name__ == "__main__":
    key = jax.random.PRNGKey(0)
    # Even channel count so the input splits into two halves.
    x = jax.random.normal(key, (2, 8, 16, 16), dtype=jnp.float32)

    y = simple_gate(x)
    jax.block_until_ready(y)

    # Reference check in plain JAX.  The kernel default uses the tanh GELU
    # (EUP path); compare tightly against the same formulation, and loosely
    # against PyTorch nn.GELU's exact-erf default.
    x1, x2 = jnp.split(x, 2, axis=1)
    y_ref_tanh = jax.nn.gelu(x1, approximate=True) * x2
    y_ref_erf = jax.nn.gelu(x1, approximate=False) * x2

    assert y.shape == (2, 4, 16, 16)
    assert jnp.allclose(y, y_ref_tanh, atol=1e-5, rtol=1e-5)
    assert jnp.allclose(y, y_ref_erf, atol=1e-2, rtol=1e-2)

    print("KERNEL_OK")
</pallas_src>

<mosaic_0001>
module attributes {stable_mosaic.version = 11 : i64} {
  func.func @simple_gate_kernel(%arg0: i32, %arg1: i32, %arg2: memref<1x1x8x128xf32, #tpu.memory_space<vmem>>, %arg3: memref<1x1x8x128xf32, #tpu.memory_space<vmem>>, %arg4: memref<1x8x128xf32, #tpu.memory_space<vmem>>) attributes {dimension_semantics = [#tpu.dimension_semantics<parallel>, #tpu.dimension_semantics<parallel>], iteration_bounds = array<i64: 2, 1>, scalar_prefetch = 0 : i64, scratch_operands = 0 : i64, tpu.core_type = #tpu.core_type<tc>, window_params = [{transform_indices = @transform_0, window_bounds = array<i64: 1, 1, 8, 128>}, {transform_indices = @transform_1, window_bounds = array<i64: 1, 1, 8, 128>}, {transform_indices = @transform_2, window_bounds = array<i64: 1, 8, 128>}]} {
    %c0 = arith.constant 0 : index
    %c0_0 = arith.constant 0 : index
    %c0_1 = arith.constant 0 : index
    %c0_2 = arith.constant 0 : index
    %0 = vector.load %arg2[%c0, %c0_0, %c0_1, %c0_2] : memref<1x1x8x128xf32, #tpu.memory_space<vmem>>, vector<1x1x8x128xf32>
    %1 = vector.shape_cast %0 : vector<1x1x8x128xf32> to vector<8x128xf32>
    %c0_3 = arith.constant 0 : index
    %c0_4 = arith.constant 0 : index
    %c0_5 = arith.constant 0 : index
    %c0_6 = arith.constant 0 : index
    %2 = vector.load %arg3[%c0_3, %c0_4, %c0_5, %c0_6] : memref<1x1x8x128xf32, #tpu.memory_space<vmem>>, vector<1x1x8x128xf32>
    %3 = vector.shape_cast %2 : vector<1x1x8x128xf32> to vector<8x128xf32>
    %4 = arith.mulf %1, %1 : vector<8x128xf32>
    %5 = arith.mulf %1, %4 : vector<8x128xf32>
    %cst = arith.constant 4.471500e-02 : f32
    %6 = vector.broadcast %cst : f32 to vector<8x128xf32>
    %7 = arith.mulf %6, %5 : vector<8x128xf32>
    %8 = arith.addf %1, %7 : vector<8x128xf32>
    %cst_7 = arith.constant 0.797884583 : f32
    %9 = vector.broadcast %cst_7 : f32 to vector<8x128xf32>
    %10 = arith.mulf %9, %8 : vector<8x128xf32>
    %11 = math.tanh %10 : vector<8x128xf32>
    %cst_8 = arith.constant 1.000000e+00 : f32
    %12 = vector.broadcast %cst_8 : f32 to vector<8x128xf32>
    %13 = arith.addf %12, %11 : vector<8x128xf32>
    %cst_9 = arith.constant 5.000000e-01 : f32
    %14 = vector.broadcast %cst_9 : f32 to vector<8x128xf32>
    %15 = arith.mulf %14, %13 : vector<8x128xf32>
    %16 = arith.mulf %1, %15 : vector<8x128xf32>
    %17 = arith.mulf %16, %3 : vector<8x128xf32>
    %c0_10 = arith.constant 0 : index
    %c0_11 = arith.constant 0 : index
    %c0_12 = arith.constant 0 : index
    %18 = vector.load %arg4[%c0_10, %c0_11, %c0_12] : memref<1x8x128xf32, #tpu.memory_space<vmem>>, vector<1x8x128xf32>
    %19 = vector.shape_cast %18 : vector<1x8x128xf32> to vector<8x128xf32>
    %20 = vector.shape_cast %17 : vector<8x128xf32> to vector<1x8x128xf32>
    tpu.vector_store %arg4[%c0_10, %c0_11, %c0_12], %20 {strides = array<i32>} : memref<1x8x128xf32, #tpu.memory_space<vmem>>, vector<1x8x128xf32>,
    return
  }
  func.func @transform_0(%arg0: i32, %arg1: i32) -> (i32, i32, i32, i32) {
    %c0_i32 = arith.constant 0 : i32
    %c0_i32_0 = arith.constant 0 : i32
    %c0_i32_1 = arith.constant 0 : i32
    return %arg0, %c0_i32, %arg1, %c0_i32_0 : i32, i32, i32, i32
  }
  func.func @transform_1(%arg0: i32, %arg1: i32) -> (i32, i32, i32, i32) {
    %c1_i32 = arith.constant 1 : i32
    %c0_i32 = arith.constant 0 : i32
    %c0_i32_0 = arith.constant 0 : i32
    return %arg0, %c1_i32, %arg1, %c0_i32 : i32, i32, i32, i32
  }
  func.func @transform_2(%arg0: i32, %arg1: i32) -> (i32, i32, i32) {
    %c0_i32 = arith.constant 0 : i32
    %c0_i32_0 = arith.constant 0 : i32
    return %arg0, %arg1, %c0_i32 : i32, i32, i32
  }
}

</mosaic_0001>

<bundles_post_ra>
// kernel: tpu_custom_call.1
= control target key start
LH: loop header
LB: loop body
LE: loop exit
PB: predicated region body
PF: predicated region fallthrough
CT: control target
= control target key end

     0   :  { %7 = vsyncpa [#allocation3], 0  ;;  %s753_s0 = inlined_call_operand.hbm [shape: f32[2,2,8,128], index: 0, kind: input, shape index: {}]   ;;  %s754_s1 = inlined_call_operand.hbm [shape: f32[2,2,8,128], index: 1, kind: input, shape index: {}]   ;;  %s755_s2 = inlined_call_operand.hbm [shape: f32[2,8,128], index: 2, kind: output, shape index: {}]  }
   0x1   :  { %9 = vsyncpa [#allocation3 + $0x1], 0 }
   0x2   :  { %10 = vsyncpa [#allocation6], 0 }
   0x3   :  { %12 = vsyncpa [#allocation6 + $0x1], 0 }
   0x4   :  { %13 = vsyncpa [#allocation4], 0 }
   0x5   :  { %15 = vsyncpa [#allocation4 + $0x1], 0  ;;  %s612_s9 = smov 0   ;;  %s614_s10 = smov 0  }
   0x6   :  { %s616_s11 = smov 0   ;;  %s618_s12 = smov 0  }
   0x7   :  { %s620_s13 = smov 0   ;;  %s622_s14 = smov 0  }
   0x8 LB: > { %s360_s15 = sadd.s32 4294967295, %s595_s14   ;;  %s361_s16 = sadd.s32 4294967294, %s595_s14   ;;  %s595_s14 = sphi %s622_s14, %s21_s14   ;;  %s591_s13 = sphi %s620_s13, %s765_s13   ;;  %s587_s12 = sphi %s618_s12, %s764_s12   ;;  %s583_s11 = sphi %s616_s11, %s763_s11   ;;  %s579_s10 = sphi %s614_s10, %s762_s10   ;;  %s575_s9 = sphi %s612_s9, %s761_s9  }
   0x9   : > { %s33_s17 = sadd.s32 1, %s591_s13  ;;  %s42_s18 = sadd.s32 1, %s583_s11 }
   0xa   : > { %p35_p0 = scmp.ge.s32.totalorder %s33_s17, 2  ;;  %p49_p1 = scmp.ne.s32.totalorder %s583_s11, %s579_s10 }
   0xb   : > { %p50_p2 = scmp.eq.s32.totalorder %s595_s14, 0  ;;  %p55_p3 = scmp.ne.s32.totalorder %s579_s10, %s575_s9 }
   0xc   : > { %s767_s17 = smov (%p35_p0, %s33_s17), 0  ;;  %p56_p5 = scmp.eq.s32.totalorder %s360_s15, 0 }
   0xd   : > { %p653_p4 = por %p50_p2, %p49_p1  ;;  %s37_s20 = ssub.s32 %s591_s13, %s767_s17 }
   0xe   : > { %p109_p6 = scmp.eq.s32.totalorder %s360_s15, 1  ;;  %p40_p7 = scmp.eq.s32.totalorder %s37_s20, 0 }
   0xf   : > { %p659_p8 = por %p56_p5, %p55_p3  ;;  %p115_p10 = scmp.eq.s32.totalorder %s361_s16, 1 }
  0x10   : > { %p663_p9 = por %p109_p6, %p49_p1  ;;  %p363_p12 = scmp.ge.s32.totalorder %s595_s14, 2 }
  0x11   : > { %s668_s23 = scalar_select %p40_p7, %s583_s11, %s42_s18  }
  0x12   : > { %p670_p11 = por %p115_p10, %p55_p3  ;;  %p397_p13 = scmp.lt.s32.totalorder %s595_s14, 2 }
  0x13   : > { %s135_s25 = sand.u32 1, %s583_s11   ;;  %s378_s27 = sshll.u32 %s591_s13, 4 }
  0x14   : > { %s364_s26 = sshll.u32 %s135_s25, 3  ;;  %s145_s30 = scalar_lea.hbm %s753_s0, %s378_s27 }
  0x15   : > { %s139_s3 = scalar_lea.vmem [#allocation2], %s364_s26  ;;  %s147_s5 = sshll.u32 %s145_s30, 4  ;;  %s148_s5 = int_to_ptr.hbm [resolvable:$true] %s147_s5 }
  0x16   : > { %s149_s4 = sshll.u32 %s139_s3, 4  ;;  %p683_p0 = pnand %p397_p13, %p653_p4  ;;  %s150_s4 = int_to_ptr.vmem [resolvable:$true] %s149_s4 }
  0x17   : > { %p370_p1 = scmp.ge.s32.totalorder %s595_s14, 1  ;;  %p176_p2 = scmp.lt.s32.totalorder %s595_s14, 3 }
  0x18   : > { %s136_s7 = scalar_lea.sflag [#allocation3], %s135_s25  ;;  %s293_s16 = scalar_lea.hbm %s754_s1, %s378_s27 }
  0x19   : > { %389 = dma.hbm_to_vmem [thread:$0]  (!%p683_p0), %s148_s5, 128, %s150_s4, %s136_s7  }
  0x1a   : > { %p177_p3 = pnand %p370_p1, %p176_p2  ;;  %s160_s18 = scalar_lea.vmem [#allocation5], %s364_s26 }
  0x1b   : > { %s171_s20 = sshll.u32 %s160_s18, 4  ;;  %s294_s28 = scalar_lea.hbm %s293_s16, 8  ;;  %s172_s20 = int_to_ptr.vmem [resolvable:$true] %s171_s20 }
  0x1c   : > { %s169_s19 = sshll.u32 %s294_s28, 4  ;;  %s157_s29 = scalar_lea.sflag [#allocation6], %s135_s25  ;;  %s170_s19 = int_to_ptr.hbm [resolvable:$true] %s169_s19 }
  0x1d   : > { %392 = dma.hbm_to_vmem [thread:$0]  (!%p683_p0), %s170_s19, 128, %s172_s20, %s157_s29  }
  0x1e   : > { %180 = sbr.rel (%p177_p3) target bundleno = 67 (0x43), region = 28  ;;  %s697_s30 = sand.u32 (!%p177_p3), 1, %s579_s10  }
  0x1f   : > { %s700_s3 = sshll.u32 (!%p177_p3), %s697_s30, 3  ;;  %s183_s27 = scalar_lea.sflag (!%p177_p3), [#allocation3], %s697_s30 }
  0x20   : > { %s186_s26 = scalar_lea.vmem (!%p177_p3), [#allocation2], %s700_s3 }
  0x23   : > { %562 = dma.done.wait (%p659_p8), %s183_s27, 128  }
  0x24   : > { %564 = vsyncadd (%p659_p8), %s183_s27, 4294967168  ;;  %s193_s25 = scalar_lea.sflag [#allocation6], %s697_s30  ;;  %s196_s4 = scalar_lea.vmem [#allocation5], %s700_s3 }
  0x25   : > { %566 = dma.done.wait (%p659_p8), %s193_s25, 128  }
  0x26   : > { %568 = vsyncadd (%p659_p8), %s193_s25, 4294967168  ;;  %v223_v0 = vld [vmem:[%s186_s26] sm:$0xff]  ;;  %s375_s5 = sshll.u32 %s587_s12, 3  ;;  %v224_v9 = vld [vmem:[%s196_s4] sm:$0xff]  ;;  %s222_s21 = scalar_lea.vmem [#allocation7], %s700_s3 }
  0x27   : > { %v225_v1 = vmul.f32 %v223_v0, %v223_v0  ;;  %s248_s8 = scalar_lea.hbm %s755_s2, %s375_s5  ;;  %s250_s15 = sshll.u32 %s222_s21, 4  ;;  %s251_s15 = int_to_ptr.vmem [resolvable:$true] %s250_s15 }
  0x28   : > { %s252_s16 = sshll.u32 %s248_s8, 4  ;;  %s237_s18 = scalar_lea.sflag [#allocation4], %s697_s30  ;;  %s253_s16 = int_to_ptr.hbm [resolvable:$true] %s252_s16 }
  0x29   : > { %v226_v2 = vmul.f32 %v225_v1, %v223_v0  ;;  %s523_s20 = sshra.s32 %s253_s16, 4  ;;  %s529_s29 = scalar_lea.hbm %s755_s2, 16  ;;  %s524_s20 = int_to_ptr.hbm [resolvable:$true] %s523_s20 }
  0x2a   : > { %s525_s12 = scalar_lea.hbm %s524_s20, 8  ;;  %p530_p7 = scmp.lt.s32.totalorder %s524_s20, %s755_s2 }
  0x2b   : > { %v227_v3 = vmul.f32 0.044715, %v226_v2  ;;  %p526_p4 = scmp.ne.s32.totalorder %s524_s20, %s525_s12  ;;  %p531_p8 = scmp.lt.s32.totalorder %s529_s29, %s525_s12 }
  0x2d   : > { %v228_v4 = vadd.f32 %v227_v3, %v223_v0  ;;  %p527_p5 = pnand %p526_p4, %p663_p9  ;;  %p532_p10 = por %p531_p8, %p530_p7 }
  0x2f   : > { %v229_v5 = vmul.f32 0.7978846, %v228_v4  ;;  %p528_p6 = pneg %p527_p5 }
  0x31   : > { %447 = vtanh.f32 %v229_v5  ;;  %p533_p13 = pnand %p532_p10, %p528_p6 }
  0x37   : > { %v448_v6 = vpop.eup %447 }
  0x38   : > { %v231_v7 = vadd.f32 1.0, %v448_v6 }
  0x3a   : > { %v232_v8 = vmul.f32 0.5, %v231_v7 }
  0x3c   : > { %v233_v10 = vmul.f32 %v232_v8, %v223_v0 }
  0x3e   : > { %v234_v11 = vmul.f32 %v233_v10, %v224_v9 }
  0x40   : > { %235 = vst [vmem:[%s222_s21] sm:$0xff] %v234_v11 }
  0x41   : > { %536 = shalt.err (!%p533_p13)
}
  0x42   : > { %384 = dma.vmem_to_hbm [thread:$0]  (%p663_p9), %s251_s15, 128, %s253_s16, %s237_s18  }
  0x43 PF: > { %s264_s30 = sand.u32 1, %s575_s9   ;;  %p394_p0 = pnand %p363_p12, %p670_p11 }
  0x44   : > { %s265_s26 = scalar_lea.sflag [#allocation4], %s264_s30 }
  0x45   : > { %p395_p1 = pneg %p394_p0 }
  0x47   : > { %570 = dma.done.wait (%p395_p1), %s265_s26, 128  }
  0x48   : > { %572 = vsyncadd (%p395_p1), %s265_s26, 4294967168  ;;  %s21_s14 = sadd.s32 1, %s595_s14   ;;  %s761_s9 = smov %s579_s10 }
  0x49   : > { %p18_p2 = scmp.ge.s32.totalorder %s21_s14, 4   ;;  %s762_s10 = smov %s583_s11 }
  0x4a   : > { %s763_s11 = smov %s668_s23  ;;  %s764_s12 = smov %s591_s13 }
  0x4b   : > { %s765_s13 = smov %s767_s17  ;;  %20 = sbr.rel (!%p18_p2) target bundleno = 8 (0x8), region = 86 }
  0x50   :  { %271 = vsyncpa [#allocation3], 1 }
  0x51   :  { %273 = vsyncpa [#allocation3 + $0x1], 1 }
  0x52   :  { %274 = vsyncpa [#allocation6], 1 }
  0x53   :  { %276 = vsyncpa [#allocation6 + $0x1], 1 }
  0x54   :  { %277 = vsyncpa [#allocation4], 1 }
  0x55   :  { %279 = vsyncpa [#allocation4 + $0x1], 1 }

</bundles_post_ra>
